<compile_context>
chip_gen: v5e
topology: v5e:2x2
jax: 0.10.0
libtpu: 0.0.40
codegen_flags: <defaults>
</compile_context>

<pallas_src>
import numpy as np
import jax
import jax.numpy as jnp
from jax import lax
from jax.experimental import pallas as pl
from jax.experimental.pallas import tpu as pltpu

_EPS = 1e-5
_LANE = 128
_VMEM_BUDGET = 20 * 1024 * 1024      # per-grid-step working-set target (bytes)


def _rup(x, m):
    return (x + m - 1) // m * m


# ---------------------------------------------------------------------------
# Fused BasicBlock kernel (Nb lane-packed images per grid step).
# ---------------------------------------------------------------------------
def _make_block_kernel(P, cin_p, planes, LyT, LoT, base,
                       tap1_phase, tap1_off, tap2_off, sc_phase, sc_start, cd):
    def kernel(x_ref, w1_ref, w2_ref, bias_ref, mask_ref, o_ref, a1_ref, a2_ref):
        # ---- conv1 (3x3, stride folded into phases) + BN1 + ReLU ------------
        # K-stack the 9 taps into one (planes, 9*cin_p) x (9*cin_p, LyT) dot.
        for t in range(9):
            p = tap1_phase[t]
            s = tap1_off[t]
            a1_ref[t * cin_p:(t + 1) * cin_p, :] = x_ref[0, p, :, s:s + LyT]
        y1 = jnp.dot(w1_ref[...], a1_ref[...], preferred_element_type=jnp.float32)
        y1 = jnp.maximum(y1 + bias_ref[:, 0:1], 0.0) * mask_ref[...]
        y1 = y1.astype(cd)                      # bf16 operands for conv2's MXU dot

        # ---- conv2 (3x3, stride 1) + BN2: same K-stacking on y1 -------------
        for t in range(9):
            s = base + tap2_off[t]
            a2_ref[t * planes:(t + 1) * planes, :] = y1[:, s:s + LoT]
        acc2 = jnp.dot(w2_ref[...], a2_ref[...], preferred_element_type=jnp.float32)

        # ---- shortcut (identity / DownsampleA): direct add, no matmul -------
        sc = x_ref[0, sc_phase, :, sc_start:sc_start + LoT].astype(jnp.float32)
        if planes > cin_p:                      # DownsampleA channel zero-pad
            sc = jnp.concatenate(
                [sc, jnp.zeros((planes - cin_p, LoT), jnp.float32)], axis=0)
        elif planes < cin_p:                    # not hit by this resnet
            sc = sc[:planes, :]
        acc2 = acc2 + sc

        o_ref[0] = jnp.maximum(acc2 + bias_ref[:, 1:2], 0.0).astype(o_ref.dtype)

    return kernel


# ---------------------------------------------------------------------------
# Wrapper: layout prep (pad / phase-split / lane-pack / BN fold), pallas_call.
# ---------------------------------------------------------------------------
def basic_block_forward(x_nchw, params, stride, *,
                        compute_dtype=jnp.bfloat16, nb_max=8):
    """Fused BasicBlock forward.  x: (N, Cin, H, W) NCHW.  BN in inference mode."""
    N, cin, H, W = x_nchw.shape
    planes = params["w1"].shape[0]
    if planes % 8 != 0:
        raise ValueError("planes must be a multiple of 8")
    if stride == 1:
        if cin != planes:
            raise ValueError("stride==1 requires in_planes == planes "
                             "(DownsampleA asserts stride == 2).")
        Ho, Wo = H, W
    elif stride == 2:
        assert H % 2 == 0 and W % 2 == 0
        Ho, Wo = H // 2, W // 2
    else:
        raise ValueError("stride must be 1 or 2")

    cd = compute_dtype
    bcd = jnp.dtype(cd).itemsize
    cin_p = _rup(cin, 8)                 # sublane-aligned input channels
    Hp, Wp = Ho + 2, Wo + 2              # conv2 padded plane dims (row pitch = Wp)
    Lv = Hp * Wp                         # logical plane length
    base = Wp + 1                        # lead-in so every tap slice starts >= 0
    S = _rup(base + Lv, _LANE)           # per-image pitch (all stages)
    maxoff1 = (Wp + 1) if stride == 2 else (2 * Wp + 2)
    tail_y = _rup(2 * base, _LANE)       # extra y1 lanes so conv2 slices stay in-bounds
    tail_x = tail_y + _rup(maxoff1, _LANE)
    P = 1 if stride == 1 else 4          # number of input phase planes

    # ---- images per grid step: amortize step overhead, cap by VMEM budget ---
    per_img = S * (2 * P * cin_p * bcd          # packed input, double-buffered
                   + 9 * cin_p * bcd            # conv1 K-stack scratch
                   + 9 * planes * bcd           # conv2 K-stack scratch
                   + planes * 4                 # y1 (f32)
                   + 2 * planes * x_nchw.dtype.itemsize)   # output block
    Nb = max(1, min(nb_max, -(-N // 2)))        # keep >= 2 grid steps when N >= 2
    while Nb > 1 and Nb * per_img > _VMEM_BUDGET:
        Nb -= 1
    G = -(-N // Nb)
    Npad = G * Nb
    LoT = Nb * S
    LyT = LoT + tail_y
    LxT = LoT + tail_x

    # ---- fold BN (inference/running stats) scale into the conv weights ------
    s1 = params["g1"] / jnp.sqrt(params["v1"] + _EPS)
    s2 = params["g2"] / jnp.sqrt(params["v2"] + _EPS)
    b1 = params["b1"] - params["m1"] * s1
    b2 = params["b2"] - params["m2"] * s2
    w1 = (params["w1"] * s1[:, None, None, None]).transpose(2, 3, 0, 1)
    w1 = jnp.pad(w1.reshape(9, planes, cin), ((0, 0), (0, 0), (0, cin_p - cin)))
    w1k = w1.transpose(1, 0, 2).reshape(planes, 9 * cin_p).astype(cd)
    w2 = (params["w2"] * s2[:, None, None, None]).transpose(2, 3, 0, 1)
    w2k = w2.reshape(9, planes, planes).transpose(1, 0, 2)
    w2k = w2k.reshape(planes, 9 * planes).astype(cd)
    bias = jnp.stack([b1, b2], axis=1).astype(jnp.float32)          # (planes, 2)

    # ---- zero-padded, channels-first input phase planes, lane-packed --------
    xc = jnp.pad(x_nchw, ((0, 0), (0, cin_p - cin), (0, 0), (0, 0)))
    xp = jnp.pad(xc, ((0, 0), (0, 0), (1, 1), (1, 1)))              # (N,Cp,H+2,W+2)
    if stride == 1:
        plane = xp.reshape(N, 1, cin_p, Lv)
    else:
        phs = []
        for p in range(2):
            for q in range(2):
                ph = xp[:, :, p::2, q::2]                           # (N,Cp,Ho+1,Wo+1)
                ph = jnp.pad(ph, ((0, 0), (0, 0),
                                  (0, Hp - (Ho + 1)), (0, Wp - (Wo + 1))))
                phs.append(ph.reshape(N, cin_p, Lv))
        plane = jnp.stack(phs, axis=1)                              # (N,4,Cp,Lv)
    plane = jnp.pad(plane, ((0, Npad - N), (0, 0), (0, 0), (0, 0)))
    plane = jnp.pad(plane, ((0, 0), (0, 0), (0, 0), (base, S - base - Lv)))
    plane = plane.reshape(G, Nb, P, cin_p, S).transpose(0, 2, 3, 1, 4)
    plane = plane.reshape(G, P, cin_p, Nb * S)
    plane = jnp.pad(plane, ((0, 0), (0, 0), (0, 0), (0, tail_x))).astype(cd)
    # TODO(synk): keep this padded pitch-S layout between consecutive blocks to
    # avoid the crop / re-pad HBM round-trip at block boundaries.

    # ---- static tap tables (phase index + lane offset per 3x3 tap) ----------
    tap1_phase, tap1_off = [], []
    for kh in range(3):
        for kw in range(3):
            if stride == 1:
                tap1_phase.append(0)
                tap1_off.append(kh * Wp + kw)
            else:
                tap1_phase.append((kh % 2) * 2 + (kw % 2))
                tap1_off.append((kh // 2) * Wp + (kw // 2))
    tap2_off = [(kh - 1) * Wp + (kw - 1) for kh in range(3) for kw in range(3)]
    sc_phase, sc_start = (0, 2 * base) if stride == 1 else (3, base)

    # valid-lane mask for y1 (zeros the conv-padding ring, per-image tails and
    # the packed-plane garbage lanes)
    idx = np.arange(LyT)
    j = (idx % S) - base
    valid = ((idx // S) < Nb) & (j >= 0) & ((j // Wp) < Ho) & ((j % Wp) < Wo)
    mask = jnp.asarray(valid.astype(np.float32)).reshape(1, LyT)

    kernel = _make_block_kernel(P, cin_p, planes, LyT, LoT, base,
                                tuple(tap1_phase), tuple(tap1_off),
                                tuple(tap2_off), sc_phase, sc_start, cd)

    est = Nb * per_img + (w1k.size + w2k.size) * bcd + 4 * (bias.size + mask.size)
    vmem_limit = int(min(64 * 2**20, max(32 * 2**20, 2 * est)))

    out_flat = pl.pallas_call(
        kernel,
        out_shape=jax.ShapeDtypeStruct((G, planes, LoT), x_nchw.dtype),
        grid=(G,),
        in_specs=[
            pl.BlockSpec((1, P, cin_p, LxT), lambda g: (g, 0, 0, 0)),
            pl.BlockSpec((planes, 9 * cin_p), lambda g: (0, 0)),
            pl.BlockSpec((planes, 9 * planes), lambda g: (0, 0)),
            pl.BlockSpec((planes, 2), lambda g: (0, 0)),
            pl.BlockSpec((1, LyT), lambda g: (0, 0)),
        ],
        out_specs=pl.BlockSpec((1, planes, LoT), lambda g: (g, 0, 0)),
        scratch_shapes=[pltpu.VMEM((9 * cin_p, LyT), cd),
                        pltpu.VMEM((9 * planes, LoT), cd)],
        compiler_params=pltpu.CompilerParams(
            dimension_semantics=("parallel",),
            vmem_limit_bytes=vmem_limit),
    )(plane, w1k, w2k, bias, mask)

    # unpack lanes: (G, planes, Nb*S) -> (N, planes, Ho, Wo)
    out = out_flat.reshape(G, planes, Nb, S).transpose(0, 2, 1, 3)
    out = out.reshape(Npad, planes, S)[:N, :, :Ho * Wp]
    out = out.reshape(N, planes, Ho, Wp)[:, :, :, :Wo]
    return out


# ---------------------------------------------------------------------------
# Pure-JAX reference (lax conv, NCHW) for correctness checks.
# ---------------------------------------------------------------------------
def basic_block_reference(x, params, stride):
    def conv(x, w, s):
        return lax.conv_general_dilated(
            x, w, window_strides=(s, s), padding=((1, 1), (1, 1)),
            dimension_numbers=("NCHW", "OIHW", "NCHW"))

    def bn(y, g, b, m, v):
        return (y - m[None, :, None, None]) / jnp.sqrt(v + _EPS)[None, :, None, None] \
               * g[None, :, None, None] + b[None, :, None, None]

    y = conv(x, params["w1"], stride)
    y = jax.nn.relu(bn(y, params["g1"], params["b1"], params["m1"], params["v1"]))
    y = conv(y, params["w2"], 1)
    y = bn(y, params["g2"], params["b2"], params["m2"], params["v2"])

    planes, cin = params["w1"].shape[0], params["w1"].shape[1]
    if stride == 1 and cin == planes:
        sc = x
    else:
        sc = x[:, :, ::stride, ::stride]
        pad_c = planes - cin
        if pad_c > 0:
            sc = jnp.pad(sc, ((0, 0), (0, pad_c), (0, 0), (0, 0)))
    return jax.nn.relu(sc + y)


def init_params(key, in_planes, planes):
    ks = jax.random.split(key, 10)
    return {
        "w1": 0.05 * jax.random.normal(ks[0], (planes, in_planes, 3, 3), jnp.float32),
        "g1": 1.0 + 0.1 * jax.random.normal(ks[1], (planes,), jnp.float32),
        "b1": 0.1 * jax.random.normal(ks[2], (planes,), jnp.float32),
        "m1": 0.05 * jax.random.normal(ks[3], (planes,), jnp.float32),
        "v1": 1.0 + 0.1 * jax.random.uniform(ks[4], (planes,), jnp.float32),
        "w2": 0.05 * jax.random.normal(ks[5], (planes, planes, 3, 3), jnp.float32),
        "g2": 1.0 + 0.1 * jax.random.normal(ks[6], (planes,), jnp.float32),
        "b2": 0.1 * jax.random.normal(ks[7], (planes,), jnp.float32),
        "m2": 0.05 * jax.random.normal(ks[8], (planes,), jnp.float32),
        "v2": 1.0 + 0.1 * jax.random.uniform(ks[9], (planes,), jnp.float32),
    }


if __name__ == "__main__":
    key = jax.random.PRNGKey(0)
    k_x1, k_p1, k_x2, k_p2 = jax.random.split(key, 4)

    # Case 1: BasicBlock(in_planes=4, planes=8, stride=2) -> DownsampleA path.
    N, cin, planes, H, W, stride = 2, 4, 8, 16, 16, 2
    x1 = jax.random.normal(k_x1, (N, cin, H, W), jnp.float32)
    p1 = init_params(k_p1, cin, planes)
    ref1 = jax.block_until_ready(basic_block_reference(x1, p1, stride))

    out1 = jax.block_until_ready(basic_block_forward(x1, p1, stride))   # bf16 default
    assert out1.shape == (N, planes, H // 2, W // 2), out1.shape
    np.testing.assert_allclose(np.asarray(out1), np.asarray(ref1),
                               rtol=5e-2, atol=5e-2)

    out1_f32 = jax.block_until_ready(
        basic_block_forward(x1, p1, stride, compute_dtype=jnp.float32))
    np.testing.assert_allclose(np.asarray(out1_f32), np.asarray(ref1),
                               rtol=5e-4, atol=5e-4)

    # Case 2: BasicBlock(8, 8, stride=1), N=5 -> identity shortcut; exercises
    # multi-image lane packing (Nb>1) plus batch padding to a full grid.
    x2 = jax.random.normal(k_x2, (5, 8, 8, 8), jnp.float32)
    p2 = init_params(k_p2, 8, 8)
    ref2 = jax.block_until_ready(basic_block_reference(x2, p2, 1))

    out2 = jax.block_until_ready(basic_block_forward(x2, p2, 1))        # bf16 default
    np.testing.assert_allclose(np.asarray(out2), np.asarray(ref2),
                               rtol=5e-2, atol=5e-2)

    out2_f32 = jax.block_until_ready(
        basic_block_forward(x2, p2, 1, compute_dtype=jnp.float32))
    np.testing.assert_allclose(np.asarray(out2_f32), np.asarray(ref2),
                               rtol=5e-4, atol=5e-4)

    print("KERNEL_OK")
</pallas_src>

<mosaic_0001>
module attributes {stable_mosaic.version = 11 : i64} {
  func.func @kernel(%arg0: i32, %arg1: memref<1x4x8x384xbf16, #tpu.memory_space<vmem>>, %arg2: memref<8x72xbf16, #tpu.memory_space<vmem>>, %arg3: memref<8x72xbf16, #tpu.memory_space<vmem>>, %arg4: memref<8x2xf32, #tpu.memory_space<vmem>>, %arg5: memref<1x256xf32, #tpu.memory_space<vmem>>, %arg6: memref<1x8x128xf32, #tpu.memory_space<vmem>>, %arg7: memref<72x256xbf16, #tpu.memory_space<vmem>>, %arg8: memref<72x128xbf16, #tpu.memory_space<vmem>>) attributes {dimension_semantics = [#tpu.dimension_semantics<parallel>], iteration_bounds = array<i64: 2>, scalar_prefetch = 0 : i64, scratch_operands = 2 : i64, tpu.core_type = #tpu.core_type<tc>, window_params = [{transform_indices = @transform_0, window_bounds = array<i64: 1, 4, 8, 384>}, {pipeline_mode = #tpu.pipeline_mode<synchronous>, transform_indices = @transform_1, window_bounds = array<i64: 8, 72>}, {pipeline_mode = #tpu.pipeline_mode<synchronous>, transform_indices = @transform_2, window_bounds = array<i64: 8, 72>}, {pipeline_mode = #tpu.pipeline_mode<synchronous>, transform_indices = @transform_3, window_bounds = array<i64: 8, 2>}, {pipeline_mode = #tpu.pipeline_mode<synchronous>, transform_indices = @transform_4, window_bounds = array<i64: 1, 256>}, {transform_indices = @transform_5, window_bounds = array<i64: 1, 8, 128>}]} {
    %c0 = arith.constant 0 : index
    %c0_0 = arith.constant 0 : index
    %c0_1 = arith.constant 0 : index
    %c0_2 = arith.constant 0 : index
    %0 = vector.load %arg1[%c0, %c0_0, %c0_1, %c0_2] : memref<1x4x8x384xbf16, #tpu.memory_space<vmem>>, vector<1x1x8x256xbf16>
    %1 = vector.shape_cast %0 : vector<1x1x8x256xbf16> to vector<8x256xbf16>
    %c0_3 = arith.constant 0 : index
    %c0_4 = arith.constant 0 : index
    %2 = vector.load %arg7[%c0_3, %c0_4] : memref<72x256xbf16, #tpu.memory_space<vmem>>, vector<8x256xbf16>
    tpu.vector_store %arg7[%c0_3, %c0_4], %1 {strides = array<i32>} : memref<72x256xbf16, #tpu.memory_space<vmem>>, vector<8x256xbf16>,
    %c0_5 = arith.constant 0 : index
    %c1 = arith.constant 1 : index
    %c0_6 = arith.constant 0 : index
    %c0_7 = arith.constant 0 : index
    %3 = vector.load %arg1[%c0_5, %c1, %c0_6, %c0_7] : memref<1x4x8x384xbf16, #tpu.memory_space<vmem>>, vector<1x1x8x256xbf16>
    %4 = vector.shape_cast %3 : vector<1x1x8x256xbf16> to vector<8x256xbf16>
    %c8 = arith.constant 8 : index
    %c0_8 = arith.constant 0 : index
    %5 = vector.load %arg7[%c8, %c0_8] : memref<72x256xbf16, #tpu.memory_space<vmem>>, vector<8x256xbf16>
    tpu.vector_store %arg7[%c8, %c0_8], %4 {strides = array<i32>} : memref<72x256xbf16, #tpu.memory_space<vmem>>, vector<8x256xbf16>,
    %c0_9 = arith.constant 0 : index
    %c0_10 = arith.constant 0 : index
    %c0_11 = arith.constant 0 : index
    %c1_12 = arith.constant 1 : index
    %6 = vector.load %arg1[%c0_9, %c0_10, %c0_11, %c1_12] : memref<1x4x8x384xbf16, #tpu.memory_space<vmem>>, vector<1x1x8x256xbf16>
    %7 = vector.shape_cast %6 : vector<1x1x8x256xbf16> to vector<8x256xbf16>
    %c16 = arith.constant 16 : index
    %c0_13 = arith.constant 0 : index
    %8 = vector.load %arg7[%c16, %c0_13] : memref<72x256xbf16, #tpu.memory_space<vmem>>, vector<8x256xbf16>
    tpu.vector_store %arg7[%c16, %c0_13], %7 {strides = array<i32>} : memref<72x256xbf16, #tpu.memory_space<vmem>>, vector<8x256xbf16>,
    %c0_14 = arith.constant 0 : index
    %c2 = arith.constant 2 : index
    %c0_15 = arith.constant 0 : index
    %c0_16 = arith.constant 0 : index
    %9 = vector.load %arg1[%c0_14, %c2, %c0_15, %c0_16] : memref<1x4x8x384xbf16, #tpu.memory_space<vmem>>, vector<1x1x8x256xbf16>
    %10 = vector.shape_cast %9 : vector<1x1x8x256xbf16> to vector<8x256xbf16>
    %c24 = arith.constant 24 : index
    %c0_17 = arith.constant 0 : index
    %11 = vector.load %arg7[%c24, %c0_17] : memref<72x256xbf16, #tpu.memory_space<vmem>>, vector<8x256xbf16>
    tpu.vector_store %arg7[%c24, %c0_17], %10 {strides = array<i32>} : memref<72x256xbf16, #tpu.memory_space<vmem>>, vector<8x256xbf16>,
    %c0_18 = arith.constant 0 : index
    %c3 = arith.constant 3 : index
    %c0_19 = arith.constant 0 : index
    %c0_20 = arith.constant 0 : index
    %12 = vector.load %arg1[%c0_18, %c3, %c0_19, %c0_20] : memref<1x4x8x384xbf16, #tpu.memory_space<vmem>>, vector<1x1x8x256xbf16>
    %13 = vector.shape_cast %12 : vector<1x1x8x256xbf16> to vector<8x256xbf16>
    %c32 = arith.constant 32 : index
    %c0_21 = arith.constant 0 : index
    %14 = vector.load %arg7[%c32, %c0_21] : memref<72x256xbf16, #tpu.memory_space<vmem>>, vector<8x256xbf16>
    tpu.vector_store %arg7[%c32, %c0_21], %13 {strides = array<i32>} : memref<72x256xbf16, #tpu.memory_space<vmem>>, vector<8x256xbf16>,
    %c0_22 = arith.constant 0 : index
    %c2_23 = arith.constant 2 : index
    %c0_24 = arith.constant 0 : index
    %c1_25 = arith.constant 1 : index
    %15 = vector.load %arg1[%c0_22, %c2_23, %c0_24, %c1_25] : memref<1x4x8x384xbf16, #tpu.memory_space<vmem>>, vector<1x1x8x256xbf16>
    %16 = vector.shape_cast %15 : vector<1x1x8x256xbf16> to vector<8x256xbf16>
    %c40 = arith.constant 40 : index
    %c0_26 = arith.constant 0 : index
    %17 = vector.load %arg7[%c40, %c0_26] : memref<72x256xbf16, #tpu.memory_space<vmem>>, vector<8x256xbf16>
    tpu.vector_store %arg7[%c40, %c0_26], %16 {strides = array<i32>} : memref<72x256xbf16, #tpu.memory_space<vmem>>, vector<8x256xbf16>,
    %c0_27 = arith.constant 0 : index
    %c0_28 = arith.constant 0 : index
    %c0_29 = arith.constant 0 : index
    %c10 = arith.constant 10 : index
    %18 = vector.load %arg1[%c0_27, %c0_28, %c0_29, %c10] : memref<1x4x8x384xbf16, #tpu.memory_space<vmem>>, vector<1x1x8x256xbf16>
    %19 = vector.shape_cast %18 : vector<1x1x8x256xbf16> to vector<8x256xbf16>
    %c48 = arith.constant 48 : index
    %c0_30 = arith.constant 0 : index
    %20 = vector.load %arg7[%c48, %c0_30] : memref<72x256xbf16, #tpu.memory_space<vmem>>, vector<8x256xbf16>
    tpu.vector_store %arg7[%c48, %c0_30], %19 {strides = array<i32>} : memref<72x256xbf16, #tpu.memory_space<vmem>>, vector<8x256xbf16>,
    %c0_31 = arith.constant 0 : index
    %c1_32 = arith.constant 1 : index
    %c0_33 = arith.constant 0 : index
    %c10_34 = arith.constant 10 : index
    %21 = vector.load %arg1[%c0_31, %c1_32, %c0_33, %c10_34] : memref<1x4x8x384xbf16, #tpu.memory_space<vmem>>, vector<1x1x8x256xbf16>
    %22 = vector.shape_cast %21 : vector<1x1x8x256xbf16> to vector<8x256xbf16>
    %c56 = arith.constant 56 : index
    %c0_35 = arith.constant 0 : index
    %23 = vector.load %arg7[%c56, %c0_35] : memref<72x256xbf16, #tpu.memory_space<vmem>>, vector<8x256xbf16>
    tpu.vector_store %arg7[%c56, %c0_35], %22 {strides = array<i32>} : memref<72x256xbf16, #tpu.memory_space<vmem>>, vector<8x256xbf16>,
    %c0_36 = arith.constant 0 : index
    %c0_37 = arith.constant 0 : index
    %c0_38 = arith.constant 0 : index
    %c11 = arith.constant 11 : index
    %24 = vector.load %arg1[%c0_36, %c0_37, %c0_38, %c11] : memref<1x4x8x384xbf16, #tpu.memory_space<vmem>>, vector<1x1x8x256xbf16>
    %25 = vector.shape_cast %24 : vector<1x1x8x256xbf16> to vector<8x256xbf16>
    %c64 = arith.constant 64 : index
    %c0_39 = arith.constant 0 : index
    %26 = vector.load %arg7[%c64, %c0_39] : memref<72x256xbf16, #tpu.memory_space<vmem>>, vector<8x256xbf16>
    tpu.vector_store %arg7[%c64, %c0_39], %25 {strides = array<i32>} : memref<72x256xbf16, #tpu.memory_space<vmem>>, vector<8x256xbf16>,
    %c0_40 = arith.constant 0 : index
    %c0_41 = arith.constant 0 : index
    %27 = vector.load %arg2[%c0_40, %c0_41] : memref<8x72xbf16, #tpu.memory_space<vmem>>, vector<8x72xbf16>
    %c0_42 = arith.constant 0 : index
    %c0_43 = arith.constant 0 : index
    %28 = vector.load %arg7[%c0_42, %c0_43] : memref<72x256xbf16, #tpu.memory_space<vmem>>, vector<72x256xbf16>
    %cst = arith.constant dense<0.000000e+00> : vector<8x256xf32>
    %29 = tpu.matmul %27, %28, %cst {dimension_numbers = #tpu.dot_dimension_numbers<[1], [0], [0], [1], [0, 0, 1, 1], [], []>} : vector<8x72xbf16>, vector<72x256xbf16>, vector<8x256xf32> -> vector<8x256xf32>
    %c0_44 = arith.constant 0 : index
    %c0_45 = arith.constant 0 : index
    %30 = vector.load %arg4[%c0_44, %c0_45] : memref<8x2xf32, #tpu.memory_space<vmem>>, vector<8x1xf32>
    %31 = vector.broadcast %30 : vector<8x1xf32> to vector<8x256xf32>
    %32 = arith.addf %29, %31 : vector<8x256xf32>
    %cst_46 = arith.constant 0.000000e+00 : f32
    %33 = vector.broadcast %cst_46 : f32 to vector<8x256xf32>
    %34 = arith.maximumf %32, %33 : vector<8x256xf32>
    %c0_47 = arith.constant 0 : index
    %c0_48 = arith.constant 0 : index
    %35 = vector.load %arg5[%c0_47, %c0_48] : memref<1x256xf32, #tpu.memory_space<vmem>>, vector<1x256xf32>
    %36 = vector.broadcast %35 : vector<1x256xf32> to vector<8x256xf32>
    %37 = arith.mulf %34, %36 : vector<8x256xf32>
    %38 = arith.truncf %37 : vector<8x256xf32> to vector<8x256xbf16>
    %39 = vector.extract_strided_slice %38 {offsets = [0, 0], sizes = [8, 128], strides = [1, 1]} : vector<8x256xbf16> to vector<8x128xbf16>
    %c0_49 = arith.constant 0 : index
    %c0_50 = arith.constant 0 : index
    %40 = vector.load %arg8[%c0_49, %c0_50] : memref<72x128xbf16, #tpu.memory_space<vmem>>, vector<8x128xbf16>
    tpu.vector_store %arg8[%c0_49, %c0_50], %39 {strides = array<i32>} : memref<72x128xbf16, #tpu.memory_space<vmem>>, vector<8x128xbf16>,
    %41 = vector.extract_strided_slice %38 {offsets = [0, 1], sizes = [8, 128], strides = [1, 1]} : vector<8x256xbf16> to vector<8x128xbf16>
    %c8_51 = arith.constant 8 : index
    %c0_52 = arith.constant 0 : index
    %42 = vector.load %arg8[%c8_51, %c0_52] : memref<72x128xbf16, #tpu.memory_space<vmem>>, vector<8x128xbf16>
    tpu.vector_store %arg8[%c8_51, %c0_52], %41 {strides = array<i32>} : memref<72x128xbf16, #tpu.memory_space<vmem>>, vector<8x128xbf16>,
    %43 = vector.extract_strided_slice %38 {offsets = [0, 2], sizes = [8, 128], strides = [1, 1]} : vector<8x256xbf16> to vector<8x128xbf16>
    %c16_53 = arith.constant 16 : index
    %c0_54 = arith.constant 0 : index
    %44 = vector.load %arg8[%c16_53, %c0_54] : memref<72x128xbf16, #tpu.memory_space<vmem>>, vector<8x128xbf16>
    tpu.vector_store %arg8[%c16_53, %c0_54], %43 {strides = array<i32>} : memref<72x128xbf16, #tpu.memory_space<vmem>>, vector<8x128xbf16>,
    %45 = vector.extract_strided_slice %38 {offsets = [0, 10], sizes = [8, 128], strides = [1, 1]} : vector<8x256xbf16> to vector<8x128xbf16>
    %c24_55 = arith.constant 24 : index
    %c0_56 = arith.constant 0 : index
    %46 = vector.load %arg8[%c24_55, %c0_56] : memref<72x128xbf16, #tpu.memory_space<vmem>>, vector<8x128xbf16>
    tpu.vector_store %arg8[%c24_55, %c0_56], %45 {strides = array<i32>} : memref<72x128xbf16, #tpu.memory_space<vmem>>, vector<8x128xbf16>,
    %47 = vector.extract_strided_slice %38 {offsets = [0, 11], sizes = [8, 128], strides = [1, 1]} : vector<8x256xbf16> to vector<8x128xbf16>
    %c32_57 = arith.constant 32 : index
    %c0_58 = arith.constant 0 : index
    %48 = vector.load %arg8[%c32_57, %c0_58] : memref<72x128xbf16, #tpu.memory_space<vmem>>, vector<8x128xbf16>
    tpu.vector_store %arg8[%c32_57, %c0_58], %47 {strides = array<i32>} : memref<72x128xbf16, #tpu.memory_space<vmem>>, vector<8x128xbf16>,
    %49 = vector.extract_strided_slice %38 {offsets = [0, 12], sizes = [8, 128], strides = [1, 1]} : vector<8x256xbf16> to vector<8x128xbf16>
    %c40_59 = arith.constant 40 : index
    %c0_60 = arith.constant 0 : index
    %50 = vector.load %arg8[%c40_59, %c0_60] : memref<72x128xbf16, #tpu.memory_space<vmem>>, vector<8x128xbf16>
    tpu.vector_store %arg8[%c40_59, %c0_60], %49 {strides = array<i32>} : memref<72x128xbf16, #tpu.memory_space<vmem>>, vector<8x128xbf16>,
    %51 = vector.extract_strided_slice %38 {offsets = [0, 20], sizes = [8, 128], strides = [1, 1]} : vector<8x256xbf16> to vector<8x128xbf16>
    %c48_61 = arith.constant 48 : index
    %c0_62 = arith.constant 0 : index
    %52 = vector.load %arg8[%c48_61, %c0_62] : memref<72x128xbf16, #tpu.memory_space<vmem>>, vector<8x128xbf16>
    tpu.vector_store %arg8[%c48_61, %c0_62], %51 {strides = array<i32>} : memref<72x128xbf16, #tpu.memory_space<vmem>>, vector<8x128xbf16>,
    %53 = vector.extract_strided_slice %38 {offsets = [0, 21], sizes = [8, 128], strides = [1, 1]} : vector<8x256xbf16> to vector<8x128xbf16>
    %c56_63 = arith.constant 56 : index
    %c0_64 = arith.constant 0 : index
    %54 = vector.load %arg8[%c56_63, %c0_64] : memref<72x128xbf16, #tpu.memory_space<vmem>>, vector<8x128xbf16>
    tpu.vector_store %arg8[%c56_63, %c0_64], %53 {strides = array<i32>} : memref<72x128xbf16, #tpu.memory_space<vmem>>, vector<8x128xbf16>,
    %55 = vector.extract_strided_slice %38 {offsets = [0, 22], sizes = [8, 128], strides = [1, 1]} : vector<8x256xbf16> to vector<8x128xbf16>
    %c64_65 = arith.constant 64 : index
    %c0_66 = arith.constant 0 : index
    %56 = vector.load %arg8[%c64_65, %c0_66] : memref<72x128xbf16, #tpu.memory_space<vmem>>, vector<8x128xbf16>
    tpu.vector_store %arg8[%c64_65, %c0_66], %55 {strides = array<i32>} : memref<72x128xbf16, #tpu.memory_space<vmem>>, vector<8x128xbf16>,
    %c0_67 = arith.constant 0 : index
    %c0_68 = arith.constant 0 : index
    %57 = vector.load %arg3[%c0_67, %c0_68] : memref<8x72xbf16, #tpu.memory_space<vmem>>, vector<8x72xbf16>
    %c0_69 = arith.constant 0 : index
    %c0_70 = arith.constant 0 : index
    %58 = vector.load %arg8[%c0_69, %c0_70] : memref<72x128xbf16, #tpu.memory_space<vmem>>, vector<72x128xbf16>
    %cst_71 = arith.constant dense<0.000000e+00> : vector<8x128xf32>
    %59 = tpu.matmul %57, %58, %cst_71 {dimension_numbers = #tpu.dot_dimension_numbers<[1], [0], [0], [1], [0, 0, 1, 1], [], []>} : vector<8x72xbf16>, vector<72x128xbf16>, vector<8x128xf32> -> vector<8x128xf32>
    %c0_72 = arith.constant 0 : index
    %c3_73 = arith.constant 3 : index
    %c0_74 = arith.constant 0 : index
    %c11_75 = arith.constant 11 : index
    %60 = vector.load %arg1[%c0_72, %c3_73, %c0_74, %c11_75] : memref<1x4x8x384xbf16, #tpu.memory_space<vmem>>, vector<1x1x8x128xbf16>
    %61 = vector.shape_cast %60 : vector<1x1x8x128xbf16> to vector<8x128xbf16>
    %62 = arith.extf %61 : vector<8x128xbf16> to vector<8x128xf32>
    %63 = arith.addf %59, %62 : vector<8x128xf32>
    %c0_76 = arith.constant 0 : index
    %c1_77 = arith.constant 1 : index
    %64 = vector.load %arg4[%c0_76, %c1_77] : memref<8x2xf32, #tpu.memory_space<vmem>>, vector<8x1xf32>
    %65 = vector.broadcast %64 : vector<8x1xf32> to vector<8x128xf32>
    %66 = arith.addf %63, %65 : vector<8x128xf32>
    %cst_78 = arith.constant 0.000000e+00 : f32
    %67 = vector.broadcast %cst_78 : f32 to vector<8x128xf32>
    %68 = arith.maximumf %66, %67 : vector<8x128xf32>
    %c0_79 = arith.constant 0 : index
    %c0_80 = arith.constant 0 : index
    %c0_81 = arith.constant 0 : index
    %69 = vector.load %arg6[%c0_79, %c0_80, %c0_81] : memref<1x8x128xf32, #tpu.memory_space<vmem>>, vector<1x8x128xf32>
    %70 = vector.shape_cast %69 : vector<1x8x128xf32> to vector<8x128xf32>
    %71 = vector.shape_cast %68 : vector<8x128xf32> to vector<1x8x128xf32>
    tpu.vector_store %arg6[%c0_79, %c0_80, %c0_81], %71 {strides = array<i32>} : memref<1x8x128xf32, #tpu.memory_space<vmem>>, vector<1x8x128xf32>,
    return
  }
  func.func @transform_0(%arg0: i32) -> (i32, i32, i32, i32) {
    %c0_i32 = arith.constant 0 : i32
    %c0_i32_0 = arith.constant 0 : i32
    %c0_i32_1 = arith.constant 0 : i32
    %c0_i32_2 = arith.constant 0 : i32
    return %arg0, %c0_i32, %c0_i32_0, %c0_i32_1 : i32, i32, i32, i32
  }
  func.func @transform_1(%arg0: i32) -> (i32, i32) {
    %c0_i32 = arith.constant 0 : i32
    %c0_i32_0 = arith.constant 0 : i32
    %c0_i32_1 = arith.constant 0 : i32
    return %c0_i32, %c0_i32_0 : i32, i32
  }
  func.func @transform_2(%arg0: i32) -> (i32, i32) {
    %c0_i32 = arith.constant 0 : i32
    %c0_i32_0 = arith.constant 0 : i32
    %c0_i32_1 = arith.constant 0 : i32
    return %c0_i32, %c0_i32_0 : i32, i32
  }
  func.func @transform_3(%arg0: i32) -> (i32, i32) {
    %c0_i32 = arith.constant 0 : i32
    %c0_i32_0 = arith.constant 0 : i32
    %c0_i32_1 = arith.constant 0 : i32
    return %c0_i32, %c0_i32_0 : i32, i32
  }
  func.func @transform_4(%arg0: i32) -> (i32, i32) {
    %c0_i32 = arith.constant 0 : i32
    %c0_i32_0 = arith.constant 0 : i32
    %c0_i32_1 = arith.constant 0 : i32
    return %c0_i32, %c0_i32_0 : i32, i32
  }
  func.func @transform_5(%arg0: i32) -> (i32, i32, i32) {
    %c0_i32 = arith.constant 0 : i32
    %c0_i32_0 = arith.constant 0 : i32
    %c0_i32_1 = arith.constant 0 : i32
    return %arg0, %c0_i32, %c0_i32_0 : i32, i32, i32
  }
}

</mosaic_0001>

<bundles_post_ra>
// kernel: tpu_custom_call.1
= control target key start
LH: loop header
LB: loop body
LE: loop exit
PB: predicated region body
PF: predicated region fallthrough
CT: control target
= control target key end

     0   :  { %10 = vsyncpa [#allocation5], 0  ;;  %s1132_s0 = inlined_call_operand.hbm [shape: bf16[2,4,8,384], index: 0, kind: input, shape index: {}]   ;;  %s1133_s1 = inlined_call_operand.vmem [shape: bf16[8,72], index: 1, kind: input, shape index: {}]   ;;  %s1134_s2 = inlined_call_operand.vmem [shape: bf16[8,72], index: 2, kind: input, shape index: {}]   ;;  %s1135_s3 = inlined_call_operand.vmem [shape: f32[8,2], index: 3, kind: input, shape index: {}]   ;;  %s1136_s4 = inlined_call_operand.vmem [shape: f32[1,256], index: 4, kind: input, shape index: {}]   ;;  %s1137_s5 = inlined_call_operand.hbm [shape: f32[2,8,128], index: 5, kind: output, shape index: {}]  }
   0x1   :  { %12 = vsyncpa [#allocation5 + $0x1], 0 }
   0x2   :  { %13 = vsyncpa [#allocation6], 0 }
   0x3   :  { %15 = vsyncpa [#allocation6 + $0x1], 0  ;;  %s948_s18 = smov 0   ;;  %s950_s19 = smov 0  }
   0x4   :  { %s952_s20 = smov 0   ;;  %s954_s21 = smov 0  }
   0x5 LB: > { %s969_s22 = sadd.s32 4294967295, %s904_s21   ;;  %s658_s23 = sadd.s32 4294967294, %s904_s21   ;;  %s904_s21 = sphi %s954_s21, %s1145_s21   ;;  %s900_s20 = sphi %s952_s20, %s1144_s20   ;;  %s896_s19 = sphi %s950_s19, %s1143_s19   ;;  %s892_s18 = sphi %s948_s18, %s1142_s18  }
   0x6   : > { %s973_s24 = sadd.s32 1, %s904_s21   ;;  %s28_s25 = sadd.s32 1, %s900_s20 }
   0x7   : > { %s25_s26 = ssub.s32 %s904_s21, %s973_s24  ;;  %p35_p0 = scmp.ne.s32.totalorder %s900_s20, %s896_s19 }
   0x8   : > { %p26_p1 = scmp.eq.s32.totalorder %s25_s26, 0  ;;  %p36_p2 = scmp.eq.s32.totalorder %s904_s21, 0 }
   0x9   : > { %p41_p3 = scmp.ne.s32.totalorder %s896_s19, %s892_s18  ;;  %p42_p4 = scmp.eq.s32.totalorder %s969_s22, 0 }
   0xa   : > { %s985_s27 = scalar_select %p26_p1, %s900_s20, %s28_s25  }
   0xb   : > { %p37_p5 = por %p36_p2, %p35_p0  ;;  %p987_p6 = por %p42_p4, %p41_p3 }
   0xc   : > { %p149_p7 = scmp.eq.s32.totalorder %s969_s22, 1  ;;  %p155_p8 = scmp.eq.s32.totalorder %s658_s23, 1 }
   0xd   : > { %p660_p9 = scmp.ge.s32.totalorder %s904_s21, 2  ;;  %p754_p10 = scmp.lt.s32.totalorder %s904_s21, 2 }
   0xe   : > { %p994_p11 = por %p149_p7, %p35_p0  ;;  %p998_p12 = por %p155_p8, %p41_p3 }
   0xf   : > { %s187_s6 = sand.u32 1, %s900_s20   ;;  %s740_s7 = smul.u32 48, %s904_s21 }
  0x10   : > { %s739_s8 = smul.u32 48, %s187_s6  ;;  %p1007_p13 = pnand %p754_p10, %p37_p5 }
  0x11   : > { %s196_s11 = scalar_lea.hbm %s1132_s0, %s740_s7  ;;  %s188_s16 = scalar_lea.sflag [#allocation5], %s187_s6 }
  0x12   : > { %s197_s13 = sshll.u32 %s196_s11, 4  ;;  %s191_s14 = scalar_lea.vmem [#allocation4], %s739_s8  ;;  %s198_s13 = int_to_ptr.hbm [resolvable:$true] %s197_s13 }
  0x13   : > { %s199_s15 = sshll.u32 %s191_s14, 4  ;;  %s808_s17 = sshra.s32 %s198_s13, 4  ;;  %s200_s15 = int_to_ptr.vmem [resolvable:$true] %s199_s15  ;;  %s809_s17 = int_to_ptr.hbm [resolvable:$true] %s808_s17 }
  0x14   : > { %s810_s23 = scalar_lea.hbm %s809_s17, 48  ;;  %p812_p1 = pneg %p1007_p13 }
  0x15   : > { %p811_p0 = scmp.ne.s32.totalorder %s809_s17, %s810_s23  ;;  %s815_s7 = scalar_lea.hbm %s1132_s0, 96 }
  0x16   : > { %p816_p4 = scmp.lt.s32.totalorder %s809_s17, %s1132_s0  ;;  %p817_p5 = scmp.lt.s32.totalorder %s815_s7, %s810_s23 }
  0x17   : > { %p813_p2 = pnand %p812_p1, %p811_p0 }
  0x18   : > { %p818_p7 = por %p817_p5, %p816_p4 }
  0x19   : > { %p814_p3 = pneg %p813_p2 }
  0x1b   : > { %p819_p8 = pnand %p818_p7, %p814_p3 }
  0x1d   : > { %822 = shalt.err (!%p819_p8)
}
  0x1e   : > { %s906_s6 = smov 192   ;;  %s907_s8 = smov 12  }
  0x1f   : > { %749 = dma.hbm_to_vmem [thread:$0]  (!%p1007_p13), %s198_s13, 768, %s200_s15, %s188_s16, %s906_s6, %s906_s6, %s907_s8  }
  0x20   : > { %p662_p10 = scmp.ge.s32.totalorder %s904_s21, 1  ;;  %p207_p0 = scmp.lt.s32.totalorder %s904_s21, 3 }
  0x22   : > { %p208_p1 = pnand %p662_p10, %p207_p0 }
  0x23   : > { %s1024_s11 = sand.u32 (!%p208_p1), 1, %s896_s19  }
  0x24   : > { %211 = sbr.rel (%p208_p1) target bundleno = 625 (0x271), region = 40  ;;  %s214_s17 = scalar_lea.sflag (!%p208_p1), [#allocation5], %s1024_s11 }
  0x25   : > { %s741_s14 = smul.u32 (!%p208_p1), 48, %s1024_s11 }
  0x27   : > { %s1028_s23 = scalar_lea.vmem (!%p208_p1), [#allocation4], %s741_s14 }
  0x29   : > { %883 = dma.done.wait (%p987_p6), %s214_s17, 768  }
  0x2a   : > { %885 = vsyncadd (%p987_p6), %s214_s17, 4294966528  ;;  %v316_v0 = vld [vmem:[%s1028_s23] sm:$0xff]  ;;  %s908_s12 = smov 117   ;;  %s909_s13 = smov 118   ;;  %v667_v1 = vld [vmem:[%s1028_s23 + $0x18] sm:$0xff]  ;;  %vm261_vm0 = vcmask 1043456  }
  0x2b   : > { %320 = vrot.lane.b32.xlu0 %v316_v0, %s908_s12  ;;  %291 = vrot.lane.b32.xlu1 %v316_v0, %s909_s13  ;;  %247 = vst [vmem:[#allocation2] sm:$0xff] %v316_v0  ;;  %v669_v2 = vld [vmem:[%s1028_s23 + $0xc] sm:$0xff]  ;;  %v317_v3 = vld [vmem:[%s1028_s23 + $0x8] sm:$0xf]  ;;  %s910_s28 = smov 127   ;;  %vm298_vm1 = vcmask 965632  }
  0x2c   : > { %269 = vst [vmem:[#allocation2 + $0x18] sm:$0xff] %v667_v1  ;;  %306 = vrot.lane.b32.xlu2 %v669_v2, %s909_s13  ;;  %v288_v4 = vld [vmem:[%s1028_s23 + $0x8] sm:$0xf]  ;;  %v670_v5 = vld [vmem:[%s1028_s23 + $0x14] sm:$0xf]  ;;  %vm327_vm2 = vcmask 957440  }
  0x2d   : > { %250 = vst [vmem:[#allocation2 + $0x8] sm:$0xff] %v669_v2  ;;  %v668_v6 = vld [vmem:[%s1028_s23 + $0x20] sm:$0xf]  ;;  %v252_v7 = vld [vmem:[%s1028_s23 + $0x8] sm:$0xf]  ;;  %v911_v32 = vmov 0  }
  0x2e   : > { %v1054_v13 = vld [vmem:[%s1028_s23 + $0x24] sm:$0xff]  ;;  %800 = vset.pattern.permute.xlu1 %v911_v32  ;;  %vm263_vm3 = vcmask 1039360   ;;  %vm392_vm4 = vcmask 588800   ;;  %s912_s10 = smov 107   ;;  %s913_s6 = smov 108   ;;  %vm491_vm5 = vcmask 867328  }
  0x2f   : > { %272 = vst [vmem:[#allocation2 + $0x20] sm:$0xff] %v1054_v13  ;;  %v1065_v29 = vld [vmem:[%s1135_s3] sm:$0xff]  ;;  %s914_s8 = smov 106   ;;  %s915_s14 = smov 126   ;;  %vm484_vm6 = vcmask 875520   ;;  %vm477_vm7 = vcmask 883712  }
  0x30   : > { %s916_s17 = smov 116   ;;  %vm451_vm8 = vcmask 1031168   ;;  %vm470_vm9 = vcmask 949248  }
  0x32   : > { %v673_v61 = vld [vmem:[#allocation2] sm:$0xf]  ;;  %v727_v63 = vld [vmem:[#allocation2 + $0x4] sm:$0xf] }
  0x33   : > { %322 = vrot.lane.b32.xlu0 %v317_v3, %s908_s12  ;;  %293 = vrot.lane.b32.xlu1 %v288_v4, %s909_s13  ;;  %v730_v59 = vld [vmem:[#allocation2 + $0x14] sm:$0xf0]  ;;  %v683_v60 = vld [vmem:[#allocation2 + $0x18] sm:$0xf0] }
  0x34   : > { %308 = vrot.lane.b32.xlu2 %v670_v5, %s909_s13  ;;  %v728_v62 = vld [vmem:[#allocation2 + $0x4] sm:$0xf0]  ;;  %v675_v2 = vld [vmem:[#allocation2 + $0x8] sm:$0xf0] }
  0x35   : > { %v674_v5 = vor.u32 %v728_v62, %v673_v61 }
  0x36   : > { %v689_v51 = vld [vmem:[#allocation2 + $0x20] sm:$0xf]  ;;  %v731_v52 = vld [vmem:[#allocation2 + $0x24] sm:$0xf] }
  0x3b   : > { %279 = vrot.lane.b32.xlu1 %v668_v6, %s910_s28  ;;  %277 = vrot.lane.b32.xlu0 %v667_v1, %s910_s28  ;;  %v678_v6 = vor.u32 %v727_v63, %v675_v2 }
  0x3c   : > { %255 = vrot.lane.b32.xlu2 %v316_v0, %s910_s28 }
  0x43   : > { %257 = vrot.lane.b32.xlu0 %v252_v7, %s910_s28  ;;  %344 = vperm.xlu1 %800, %v1065_v29   ;;  %v331_v7 = vld [vmem:[%s1133_s1] sm:$0xf] }
  0x86   : > { %v307_v8 = vpop.permute.xlu2 %306 }
  0x87   : > { %v310_v9 = vrot.slane %v307_v8, 4 }
  0x8e   : > { %v309_v10 = vpop.permute.xlu2 %308 }
  0x8f   : > { %v311_v11 = vrot.slane %v309_v10, 4 }
  0x91   : > { %v312_v12 = vsel %vm261_vm0, %v310_v9, %v311_v11  ;;  %v431_v9 = vld [vmem:[%s1136_s4] sm:$0x3] }
  0x92   : > { %v313_v14 = vsel %vm298_vm1, %v307_v8, %v312_v12 }
  0x93   : > { %315 = vst [vmem:[#allocation2 + $0x38] sm:$0xff] %v313_v14  ;;  %v433_v14 = vperm.slane %v431_v9, 0 }
  0x96   : > { %v256_v41 = vpop.permute.xlu2 %255 }
  0x97   : > { %v259_v48 = vrot.slane %v256_v41, 4 }
  0x9a   : > { %v734_v42 = vld [vmem:[#allocation2 + $0x34] sm:$0xf0]  ;;  %v699_v43 = vld [vmem:[#allocation2 + $0x38] sm:$0xf0] }
  0x9d   : > { %v321_v15 = vpop.permute.xlu0 %320  ;;  %v292_v16 = vpop.permute.xlu1 %291 }
  0x9e   : > { %v324_v19 = vrot.slane %v321_v15, 4  ;;  %v295_v20 = vrot.slane %v292_v16, 4 }
  0xa5   : > { %v323_v17 = vpop.permute.xlu0 %322  ;;  %v294_v18 = vpop.permute.xlu1 %293 }
  0xa6   : > { %v325_v21 = vrot.slane %v323_v17, 4  ;;  %v296_v22 = vrot.slane %v294_v18, 4 }
  0xa8   : > { %v326_v23 = vsel %vm261_vm0, %v324_v19, %v325_v21  ;;  %v297_v24 = vsel %vm261_vm0, %v295_v20, %v296_v22 }
  0xa9   : > { %v328_v25 = vsel %vm327_vm2, %v321_v15, %v326_v23  ;;  %v299_v26 = vsel %vm298_vm1, %v292_v16, %v297_v24  ;;  %v434_v16 = vperm.slane %v431_v9, 1 }
  0xaa   : > { %v372_v27 = vunpack.c.l.b16 %v328_v25  ;;  %v373_v28 = vunpack.c.h.b16 %v328_v25  ;;  %301 = vst [vmem:[#allocation2 + $0x30] sm:$0xff] %v299_v26 }
  0xac   : > { %v382_v30 = vpack.c.b16 %v372_v27, %v372_v27  ;;  %v383_v31 = vpack.c.b16 %v373_v28, %v373_v28 }
  0xad   : > { %v280_v33 = vpop.permute.xlu1 %279  ;;  %v278_v34 = vpop.permute.xlu0 %277 }
  0xae   : > { %v282_v35 = vrot.slane %v280_v33, 4  ;;  %v281_v36 = vrot.slane %v278_v34, 4  ;;  %v398_v37 = vsel %vm261_vm0, %v382_v30, 0  ;;  %v401_v38 = vsel %vm261_vm0, %v383_v31, 0 }
  0xaf   : > { %406 = vmatpush.bf16.msra.mxu0 %v398_v37  ;;  %419 = vmatpush.bf16.msra.mxu1 %v401_v38 }
  0xb0   : > { %v283_v39 = vsel %vm261_vm0, %v281_v36, %v282_v35 }
  0xb1   : > { %v284_v40 = vsel %vm263_vm3, %v278_v34, %v283_v39  ;;  %v697_v44 = vld [vmem:[#allocation2 + $0x30] sm:$0xf]  ;;  %v733_v45 = vld [vmem:[#allocation2 + $0x34] sm:$0xf] }
  0xb2   : > { %286 = vst [vmem:[#allocation2 + $0x28] sm:$0xff] %v284_v40  ;;  %v698_v46 = vor.u32 %v734_v42, %v697_v44  ;;  %v702_v47 = vor.u32 %v733_v45, %v699_v43  ;;  %v506_v42 = vunpack.c.l.bf16 %v1054_v13  ;;  %v507_v43 = vunpack.c.h.bf16 %v1054_v13 }
  0xb4   : > { %407 = vmatpush.bf16.msra.mxu0 %v698_v46  ;;  %420 = vmatpush.bf16.msra.mxu1 %v702_v47  ;;  %v801_v46 = vpack.i.bf16 %v507_v43, %v506_v42  ;;  %v917_v47 = vmov 1  }
  0xb5   : > { %v258_v49 = vpop.permute.xlu0 %257  ;;  %v345_v8 = vpop.permute.xlu1 %344  ;;  %806 = vset.pattern.permute.xlu2 %v917_v47  ;;  %807 = vset.pattern.permute.xlu0 %v917_v47 }
  0xb6   : > { %v260_v50 = vrot.slane %v258_v49, 4 }
  0xb8   : > { %v262_v53 = vsel %vm261_vm0, %v259_v48, %v260_v50 }
  0xb9   : > { %v264_v54 = vsel %vm263_vm3, %v256_v41, %v262_v53  ;;  %v732_v55 = vld [vmem:[#allocation2 + $0x24] sm:$0xf0]  ;;  %v691_v56 = vld [vmem:[#allocation2 + $0x28] sm:$0xf0] }
  0xba   : > { %266 = vst [vmem:[#allocation2 + $0x10] sm:$0xff] %v264_v54  ;;  %v690_v57 = vor.u32 %v732_v55, %v689_v51  ;;  %v694_v58 = vor.u32 %v731_v52, %v691_v56 }
  0xbc   : > { %408 = vmatpush.bf16.msra.mxu0 %v690_v57  ;;  %421 = vmatpush.bf16.msra.mxu1 %v694_v58 }
  0xc1   : > { %v681_v0 = vld [vmem:[#allocation2 + $0x10] sm:$0xf]  ;;  %v729_v1 = vld [vmem:[#allocation2 + $0x14] sm:$0xf] }
  0xc2   : > { %v682_v3 = vor.u32 %v730_v59, %v681_v0  ;;  %v686_v4 = vor.u32 %v729_v1, %v683_v60  ;;  %v495_v59 = vld [vmem:[%s1134_s2] sm:$0xf] }
  0xc4   : > { %409 = vmatpush.bf16.msra.mxu0 %v682_v3  ;;  %422 = vmatpush.bf16.msra.mxu1 %v686_v4 }
  0xc8   : > { %410 = vmatpush.bf16.msra.mxu0 %v674_v5  ;;  %423 = vmatpush.bf16.msra.mxu1 %v678_v6 }
  0xcb   : > { %703 = vmatmul.msk.bf16.vlgmr.msra.gmra.mxu0 %vm392_vm4, %v331_v7  ;;  %704 = vmatmul.msk.bf16.vlgmr.msra.gmra.mxu1 %vm392_vm4, %v331_v7 }
 0x148   : > { %v412_v10 = vpop.f32.mrf.mxu0  ;;  %v425_v11 = vpop.f32.mrf.mxu1 }
 0x149   : > { %v413_v12 = vadd.f32 %v412_v10, %v345_v8  ;;  %v426_v15 = vadd.f32 %v425_v11, %v345_v8 }
 0x14b   : > { %v429_v17 = vmax.f32 %v413_v12, 0.0  ;;  %v430_v18 = vmax.f32 %v426_v15, 0.0 }
 0x14d   : > { %v437_v19 = vmul.f32 %v433_v14, %v429_v17  ;;  %v438_v20 = vmul.f32 %v434_v16, %v430_v18 }
 0x14f   : > { %v439_v21 = vpack.c.bf16 %v438_v20, %v437_v19 }
 0x150   : > { %v414_v22 = vpop.f32.mrf.mxu0  ;;  %v427_v23 = vpop.f32.mrf.mxu1 }
 0x151   : > { %440 = vst [vmem:[#allocation3] sm:$0xf] %v439_v21  ;;  %481 = vrot.lane.b32.xlu1 %v439_v21, %s912_s10  ;;  %474 = vrot.lane.b32.xlu0 %v439_v21, %s913_s6 }
 0x152   : > { %488 = vrot.lane.b32.xlu2 %v439_v21, %s914_s8 }
 0x159   : > { %448 = vrot.lane.b32.xlu1 %v439_v21, %s915_s14  ;;  %467 = vrot.lane.b32.xlu0 %v439_v21, %s916_s17  ;;  %s858_s17 = scalar_lea.hbm %s1137_s5, 16 }
 0x15a   : > { %461 = vrot.lane.b32.xlu2 %v439_v21, %s908_s12 }
 0x161   : > { %442 = vrot.lane.b32.xlu0 %v439_v21, %s910_s28  ;;  %802 = vrot.lane.b32.xlu1 %v801_v46, %s908_s12  ;;  %s724_s28 = sshll.u32 %s969_s22, 3  ;;  %s573_s22 = scalar_lea.sflag [#allocation6], %s1024_s11 }
 0x162   : > { %455 = vrot.lane.b32.xlu2 %v439_v21, %s909_s13  ;;  %s663_s13 = sshll.u32 %s1024_s11, 3  ;;  %s583_s25 = scalar_lea.hbm %s1137_s5, %s724_s28 }
 0x163   : > { %s244_s26 = scalar_lea.vmem [#allocation7], %s663_s13  ;;  %s587_s9 = sshll.u32 %s583_s25, 4  ;;  %s588_s9 = int_to_ptr.hbm [resolvable:$true] %s587_s9 }
 0x164   : > { %s585_s7 = sshll.u32 %s244_s26, 4  ;;  %s852_s10 = sshra.s32 %s588_s9, 4  ;;  %s586_s7 = int_to_ptr.vmem [resolvable:$true] %s585_s7  ;;  %s853_s10 = int_to_ptr.hbm [resolvable:$true] %s852_s10 }
 0x165   : > { %s854_s6 = scalar_lea.hbm %s853_s10, 8  ;;  %p859_p3 = scmp.lt.s32.totalorder %s853_s10, %s1137_s5 }
 0x166   : > { %p855_p6 = scmp.ne.s32.totalorder %s853_s10, %s854_s6  ;;  %p860_p4 = scmp.lt.s32.totalorder %s858_s17, %s854_s6 }
 0x168   : > { %p856_p13 = pnand %p855_p6, %p994_p11  ;;  %p861_p5 = por %p860_p4, %p859_p3 }
 0x16a   : > { %566 = vperm.xlu2 %806, %v1065_v29   ;;  %p857_p2 = pneg %p856_p13 }
 0x16c   : > { %p862_p7 = pnand %p861_p5, %p857_p2 }
 0x1ac   : > { %v489_v24 = vpop.permute.xlu2 %488 }
 0x1ad   : > { %v490_v25 = vrot.slane %v489_v24, 4 }
 0x1af   : > { %v492_v26 = vsel %vm491_vm5, %v489_v24, %v490_v25 }
 0x1b0   : > { %494 = vst [vmem:[#allocation3 + $0x20] sm:$0xf] %v492_v26 }
 0x1b4   : > { %v462_v27 = vpop.permute.xlu2 %461 }
 0x1b5   : > { %v463_v28 = vrot.slane %v462_v27, 4 }
 0x1b7   : > { %v464_v30 = vsel %vm327_vm2, %v462_v27, %v463_v28  ;;  %v504_v31 = vld [vmem:[#allocation3 + $0x20] sm:$0xf] }
 0x1b8   : > { %466 = vst [vmem:[#allocation3 + $0x10] sm:$0xf] %v464_v30  ;;  %v525_v32 = vunpack.c.l.b16 %v504_v31 }
 0x1ba   : > { %v530_v33 = vpack.c.b16 %v525_v32, %v525_v32 }
 0x1bc   : > { %v456_v34 = vpop.permute.xlu2 %455  ;;  %v548_v35 = vsel %vm261_vm0, %v530_v33, 0 }
 0x1bd   : > { %v457_v36 = vrot.slane %v456_v34, 4  ;;  %553 = vmatpush.bf16.msra.mxu2 %v548_v35 }
 0x1bf   : > { %v458_v37 = vsel %vm298_vm1, %v456_v34, %v457_v36 }
 0x1c0   : > { %460 = vst [vmem:[#allocation3 + $0xc] sm:$0xf] %v458_v37 }
 0x1c3   : > { %v482_v38 = vpop.permute.xlu1 %481  ;;  %v475_v39 = vpop.permute.xlu0 %474 }
 0x1c4   : > { %v483_v40 = vrot.slane %v482_v38, 4  ;;  %v476_v41 = vrot.slane %v475_v39, 4  ;;  %v567_v1 = vpop.permute.xlu2 %566 }
 0x1c6   : > { %v485_v44 = vsel %vm484_vm6, %v482_v38, %v483_v40  ;;  %v478_v45 = vsel %vm477_vm7, %v475_v39, %v476_v41 }
 0x1c7   : > { %487 = vst [vmem:[#allocation3 + $0x1c] sm:$0xf] %v485_v44 }
 0x1c8   : > { %480 = vst [vmem:[#allocation3 + $0x18] sm:$0xf] %v478_v45 }
 0x1cb   : > { %v449_v48 = vpop.permute.xlu1 %448  ;;  %v468_v49 = vpop.permute.xlu0 %467 }
 0x1cc   : > { %v450_v50 = vrot.slane %v449_v48, 4  ;;  %v469_v51 = vrot.slane %v468_v49, 4 }
 0x1ce   : > { %v452_v52 = vsel %vm451_vm8, %v449_v48, %v450_v50  ;;  %v471_v13 = vsel %vm470_vm9, %v468_v49, %v469_v51 }
 0x1cf   : > { %454 = vst [vmem:[#allocation3 + $0x8] sm:$0xf] %v452_v52  ;;  %v738_v53 = vld [vmem:[#allocation3 + $0x18] sm:$0xff] }
 0x1d0   : > { %473 = vst [vmem:[#allocation3 + $0x14] sm:$0xf] %v471_v13  ;;  %554 = vmatpush.bf16.msra.mxu2 %v738_v53 }
 0x1d3   : > { %v443_v54 = vpop.permute.xlu0 %442  ;;  %v803_v60 = vpop.permute.xlu1 %802 }
 0x1d4   : > { %v444_v55 = vrot.slane %v443_v54, 4  ;;  %v805_v61 = vunpack.i.h.bf16 %v803_v60  ;;  %v804_v62 = vunpack.i.l.bf16 %v803_v60 }
 0x1d6   : > { %v445_v29 = vsel %vm263_vm3, %v443_v54, %v444_v55  ;;  %v736_v57 = vld [vmem:[#allocation3 + $0x8] sm:$0xff]  ;;  %v542_v63 = vsel %vm327_vm2, %v804_v62, %v805_v61 }
 0x1d7   : > { %447 = vst [vmem:[#allocation3 + $0x4] sm:$0xf] %v445_v29  ;;  %v737_v56 = vld [vmem:[#allocation3 + $0x10] sm:$0xff] }
 0x1d8   : > { %555 = vmatpush.bf16.msra.mxu2 %v737_v56 }
 0x1dc   : > { %556 = vmatpush.bf16.msra.mxu2 %v736_v57 }
 0x1de   : > { %v735_v58 = vld [vmem:[#allocation3] sm:$0xff] }
 0x1e0   : > { %557 = vmatpush.bf16.msra.mxu2 %v735_v58 }
 0x1e3   : > { %722 = vmatmul.msk.bf16.vlgmr.msra.gmra.mxu2 %vm392_vm4, %v495_v59 }
 0x266   : > { %v559_v0 = vpop.f32.mrf.mxu2 }
 0x267   : > { %v560_v2 = vadd.f32 %v559_v0, %v542_v63 }
 0x269   : > { %v569_v3 = vadd.f32 %v567_v1, %v560_v2 }
 0x26b   : > { %v570_v4 = vmax.f32 %v569_v3, 0.0 }
 0x26d   : > { %571 = vst [vmem:[%s244_s26] sm:$0xff] %v570_v4 }
 0x26e   : > { %v561_v5 = vpop.f32.mrf.mxu2 }
 0x26f   : > { %865 = shalt.err (!%p862_p7)
}
 0x270   : > { %744 = dma.vmem_to_hbm [thread:$0]  (%p994_p11), %s586_s7, 128, %s588_s9, %s573_s22  }
 0x271 PF: > { %s599_s11 = sand.u32 1, %s892_s18   ;;  %p751_p8 = pnand %p660_p9, %p998_p12 }
 0x272   : > { %s600_s13 = scalar_lea.sflag [#allocation6], %s599_s11 }
 0x273   : > { %p752_p10 = pneg %p751_p8 }
 0x275   : > { %887 = dma.done.wait (%p752_p10), %s600_s13, 128  }
 0x276   : > { %889 = vsyncadd (%p752_p10), %s600_s13, 4294967168  ;;  %p18_p0 = scmp.ge.s32.totalorder %s973_s24, 4   ;;  %s1142_s18 = smov %s896_s19 }
 0x277   : > { %s1143_s19 = smov %s900_s20  ;;  %s1144_s20 = smov %s985_s27 }
 0x278   : > { %s1145_s21 = smov %s973_s24  ;;  %20 = sbr.rel (!%p18_p0) target bundleno = 5 (0x5), region = 88 }
 0x27d   :  { %606 = vsyncpa [#allocation5], 1 }
 0x27e   :  { %608 = vsyncpa [#allocation5 + $0x1], 1 }
 0x27f   :  { %609 = vsyncpa [#allocation6], 1 }
 0x280   :  { %611 = vsyncpa [#allocation6 + $0x1], 1 }

</bundles_post_ra>
